<compile_context>
chip_gen: v5e
topology: v5e:2x2
jax: 0.10.0
libtpu: 0.0.40
codegen_flags: <defaults>
</compile_context>

<pallas_src>
import functools

import jax
import jax.numpy as jnp
from jax.experimental import pallas as pl
from jax.experimental.pallas import tpu as pltpu


def _patch_merge_kernel(x_ref, bias_ref, w_ref, o_ref, *, eps, mm_dtype):
    # x_ref:    (tr, 2, W2, 2C)   contiguous chunk of the reshaped input view
    # bias_ref: (1, 2C_out) f32   beta @ W.T
    # w_ref:    (4C, 2C_out)      row-permuted diag(gamma) @ W.T (matmul dtype)
    # o_ref:    (tr*W2, 2C_out)
    tr, _, w2, c2 = x_ref.shape
    rows = tr * w2
    inv_4c = 1.0 / (2.0 * c2)          # 4C = 2 * c2

    x = x_ref[...]
    # 2x2 deinterleave in VMEM: even-h rows carry channels [x0 | x2],
    # odd-h rows carry [x1 | x3] (w parities are adjacent in the 2C last dim).
    a = x[:, 0].reshape(rows, c2).astype(jnp.float32)
    b = x[:, 1].reshape(rows, c2).astype(jnp.float32)

    # One-pass LayerNorm statistics over the 4C "virtual" channels.
    s = jnp.sum(a, axis=-1, keepdims=True) + jnp.sum(b, axis=-1, keepdims=True)
    ss = (jnp.sum(a * a, axis=-1, keepdims=True)
          + jnp.sum(b * b, axis=-1, keepdims=True))
    mean = s * inv_4c
    var = jnp.maximum(ss * inv_4c - mean * mean, 0.0)
    scale = jax.lax.rsqrt(var + eps)
    shift = -mean * scale

    an = (a * scale + shift).astype(mm_dtype)
    bn = (b * scale + shift).astype(mm_dtype)

    # Single K=4C MXU matmul; kernel channel order [x0, x2, x1, x3] matches the
    # row-permuted weight prepared in the wrapper.  f32 accumulation.
    xc = jnp.concatenate([an, bn], axis=-1)            # (rows, 4C)
    out = jnp.dot(xc, w_ref[...], preferred_element_type=jnp.float32)
    out = out + bias_ref[...]
    o_ref[...] = out.astype(o_ref.dtype)


def _default_vmem_limit_bytes():
    """~5/8 of physical VMEM, capped: ~40 MiB on v7x (64 MiB), 48 MiB on v5e/v6e."""
    cap = 64 * 1024 * 1024             # conservative fallback (v7x per-core VMEM)
    try:
        cap = int(pltpu.get_tpu_info().vmem_capacity_bytes)
    except Exception:
        pass
    return int(max(32 * 1024 * 1024, min(cap * 5 // 8, 48 * 1024 * 1024)))


def _divisors(n):
    small, large = [], []
    d = 1
    while d * d <= n:
        if n % d == 0:
            small.append(d)
            if d * d != n:
                large.append(n // d)
        d += 1
    return small + large[::-1]


def _pick_row_tile(R, W2, cap):
    """Largest divisor of R that fits the per-step cap and keeps the output
    block's sublane dim (tr*W2) a multiple of 8 (or equal to the full array)."""
    ok = [d for d in _divisors(R) if (d * W2) % 8 == 0 or d == R]
    under = [d for d in ok if d <= cap]
    return max(under) if under else min(ok)


def patch_merging(x, gamma, beta, weight, input_resolution, *, eps=1e-5,
                  matmul_dtype=None, min_grid_steps=8):
    """x: (B, H*W, C).  weight: PyTorch Linear weight of shape (2C, 4C).
    gamma/beta: LayerNorm(4C) affine.  Returns (B, H/2*W/2, 2C)."""
    H, W = input_resolution
    B, L, C = x.shape
    assert L == H * W, "input feature has wrong size"
    assert H % 2 == 0 and W % 2 == 0, f"x size ({H}*{W}) are not even."

    R, W2 = B * (H // 2), W // 2
    C2, C4, Cout = 2 * C, 4 * C, 2 * C
    M = R * W2
    dt = x.dtype
    mm_dtype = jnp.dtype(matmul_dtype) if matmul_dtype is not None else jnp.dtype(dt)
    itemsize = jnp.dtype(dt).itemsize
    mm_itemsize = mm_dtype.itemsize

    # --- free (bitcast-level) view: (B, H*W, C) -> (R, 2, W2, 2C).  No HBM copy.
    xv = x.reshape(R, 2, W2, C2)

    # --- fold LayerNorm affine into the reduction weight / output bias, then
    # permute rows from the reference order [x0,x1,x2,x3] to the kernel's
    # in-memory order [x0,x2,x1,x3].  (Note: gamma is applied at mm_dtype
    # precision once folded — within bf16 tolerance.)
    g32 = gamma.astype(jnp.float32).reshape(C4)
    b32 = beta.astype(jnp.float32).reshape(C4)
    wt32 = weight.astype(jnp.float32).T                       # (4C, 2C_out)
    w_folded = g32[:, None] * wt32                            # diag(gamma) @ W.T
    bias_out = (b32[None, :] @ wt32).astype(jnp.float32)      # (1, 2C_out)
    w_kernel = jnp.concatenate(
        [w_folded[0:C], w_folded[2 * C:3 * C],
         w_folded[C:2 * C], w_folded[3 * C:4 * C]], axis=0).astype(mm_dtype)

    # --- VMEM budget / row-tile selection (units of one h-pair image row).
    vmem_limit = _default_vmem_limit_bytes()
    in_per_tr = 2 * W2 * C2                                   # = 2*W*C elems
    out_per_tr = W2 * Cout                                    # = W*C elems
    per_tr_bytes = (2 * in_per_tr * itemsize                  # dbl-buffered input
                    + 2 * out_per_tr * itemsize               # dbl-buffered output
                    + in_per_tr * 4                           # f32 a/b working set
                    + in_per_tr * mm_itemsize                 # matmul-dtype concat
                    + out_per_tr * 4)                         # f32 matmul result
    fixed_bytes = (2 * (C4 * Cout * mm_itemsize + Cout * 4)   # weight+bias (2 bufs)
                   + (2 << 20))                               # compiler scratch slack
    cap = max(1, (vmem_limit - fixed_bytes) // per_tr_bytes)
    if R >= min_grid_steps:                                   # keep grid steps for v7x
        cap = max(1, min(cap, R // min_grid_steps))
    tr = _pick_row_tile(R, W2, cap)
    grid = (R // tr,)

    out = pl.pallas_call(
        functools.partial(_patch_merge_kernel, eps=eps, mm_dtype=mm_dtype),
        out_shape=jax.ShapeDtypeStruct((M, Cout), dt),
        grid_spec=pltpu.PrefetchScalarGridSpec(
            num_scalar_prefetch=0,
            grid=grid,
            in_specs=[
                pl.BlockSpec((tr, 2, W2, C2), lambda i: (i, 0, 0, 0)),
                pl.BlockSpec((1, Cout), lambda i: (0, 0)),
                pl.BlockSpec((C4, Cout), lambda i: (0, 0)),
            ],
            out_specs=pl.BlockSpec((tr * W2, Cout), lambda i: (i, 0)),
        ),
        compiler_params=pltpu.CompilerParams(
            dimension_semantics=("parallel",),
            vmem_limit_bytes=vmem_limit,
        ),
    )(xv, bias_out, w_kernel)

    return out.reshape(B, (H // 2) * W2, Cout)


def reference_patch_merging(x, gamma, beta, weight, input_resolution, eps=1e-5):
    """Pure-JAX (f32) reference mirroring the PyTorch forward."""
    H, W = input_resolution
    B, L, C = x.shape
    xv = x.reshape(B, H, W, C)
    x0 = xv[:, 0::2, 0::2, :]
    x1 = xv[:, 1::2, 0::2, :]
    x2 = xv[:, 0::2, 1::2, :]
    x3 = xv[:, 1::2, 1::2, :]
    xc = jnp.concatenate([x0, x1, x2, x3], axis=-1).reshape(B, -1, 4 * C)
    mean = jnp.mean(xc, axis=-1, keepdims=True)
    var = jnp.mean((xc - mean) ** 2, axis=-1, keepdims=True)
    xn = (xc - mean) / jnp.sqrt(var + eps) * gamma + beta
    return xn @ weight.T


if __name__ == "__main__":
    # Small shapes consistent with the module: B=2, H=W=16, C=4.
    B, H, W, C = 2, 16, 16, 4
    key = jax.random.PRNGKey(0)
    kx, kw, kg, kb = jax.random.split(key, 4)

    x = jax.random.normal(kx, (B, H * W, C), dtype=jnp.float32)
    # nn.Linear(4*dim, 2*dim, bias=False): weight shape (2C, 4C)
    weight = jax.random.normal(kw, (2 * C, 4 * C), dtype=jnp.float32) * 0.05
    # nn.LayerNorm(4*dim): perturbed deterministically.
    gamma = jnp.ones((4 * C,), jnp.float32) + 0.01 * jax.random.normal(kg, (4 * C,))
    beta = jnp.zeros((4 * C,), jnp.float32) + 0.01 * jax.random.normal(kb, (4 * C,))

    ref = reference_patch_merging(x, gamma, beta, weight, (H, W))

    # f32 path.
    out = patch_merging(x, gamma, beta, weight, (H, W))
    out = jax.block_until_ready(out)
    assert out.shape == (B, (H // 2) * (W // 2), 2 * C), out.shape
    assert jnp.allclose(out, ref, atol=2e-3, rtol=2e-3), float(
        jnp.max(jnp.abs(out - ref)))

    # f32 inputs with the optional bf16-MXU path (f32 stats / accumulation).
    out_mm = patch_merging(x, gamma, beta, weight, (H, W),
                           matmul_dtype=jnp.bfloat16)
    out_mm = jax.block_until_ready(out_mm)
    assert jnp.allclose(out_mm, ref, atol=3e-2, rtol=3e-2), float(
        jnp.max(jnp.abs(out_mm - ref)))

    # bf16 path (native-MXU dtype, looser tolerance vs the f32 reference).
    xb = x.astype(jnp.bfloat16)
    wb = weight.astype(jnp.bfloat16)
    gb = gamma.astype(jnp.bfloat16)
    bb = beta.astype(jnp.bfloat16)
    out_bf = patch_merging(xb, gb, bb, wb, (H, W))
    out_bf = jax.block_until_ready(out_bf)
    ref_bf = reference_patch_merging(
        xb.astype(jnp.float32), gb.astype(jnp.float32),
        bb.astype(jnp.float32), wb.astype(jnp.float32), (H, W))
    assert jnp.allclose(out_bf.astype(jnp.float32), ref_bf, atol=3e-2, rtol=3e-2), \
        float(jnp.max(jnp.abs(out_bf.astype(jnp.float32) - ref_bf)))

    print("KERNEL_OK")
</pallas_src>

<mosaic_0001>
module attributes {stable_mosaic.version = 11 : i64} {
  func.func @_patch_merge_kernel(%arg0: i32, %arg1: memref<2x2x8x8xf32, #tpu.memory_space<vmem>>, %arg2: memref<1x8xf32, #tpu.memory_space<vmem>>, %arg3: memref<16x8xf32, #tpu.memory_space<vmem>>, %arg4: memref<16x8xf32, #tpu.memory_space<vmem>>) attributes {dimension_semantics = [#tpu.dimension_semantics<parallel>], iteration_bounds = array<i64: 8>, scalar_prefetch = 0 : i64, scratch_operands = 0 : i64, tpu.core_type = #tpu.core_type<tc>, window_params = [{transform_indices = @transform_0, window_bounds = array<i64: 2, 2, 8, 8>}, {pipeline_mode = #tpu.pipeline_mode<synchronous>, transform_indices = @transform_1, window_bounds = array<i64: 1, 8>}, {pipeline_mode = #tpu.pipeline_mode<synchronous>, transform_indices = @transform_2, window_bounds = array<i64: 16, 8>}, {transform_indices = @transform_3, window_bounds = array<i64: 16, 8>}]} {
    %c0 = arith.constant 0 : index
    %c0_0 = arith.constant 0 : index
    %c0_1 = arith.constant 0 : index
    %c0_2 = arith.constant 0 : index
    %0 = vector.load %arg1[%c0, %c0_0, %c0_1, %c0_2] : memref<2x2x8x8xf32, #tpu.memory_space<vmem>>, vector<2x2x8x8xf32>
    %1 = vector.extract_strided_slice %0 {offsets = [0, 0, 0, 0], sizes = [2, 1, 8, 8], strides = [1, 1, 1, 1]} : vector<2x2x8x8xf32> to vector<2x1x8x8xf32>
    %2 = vector.shape_cast %1 : vector<2x1x8x8xf32> to vector<2x8x8xf32>
    %3 = vector.shape_cast %2 : vector<2x8x8xf32> to vector<16x8xf32>
    %4 = vector.extract_strided_slice %0 {offsets = [0, 1, 0, 0], sizes = [2, 1, 8, 8], strides = [1, 1, 1, 1]} : vector<2x2x8x8xf32> to vector<2x1x8x8xf32>
    %5 = vector.shape_cast %4 : vector<2x1x8x8xf32> to vector<2x8x8xf32>
    %6 = vector.shape_cast %5 : vector<2x8x8xf32> to vector<16x8xf32>
    %cst = arith.constant dense<0.000000e+00> : vector<16xf32>
    %7 = vector.multi_reduction <add>, %3, %cst [1] : vector<16x8xf32> to vector<16xf32>
    %8 = vector.shape_cast %7 : vector<16xf32> to vector<16x1xf32>
    %cst_3 = arith.constant dense<0.000000e+00> : vector<16xf32>
    %9 = vector.multi_reduction <add>, %6, %cst_3 [1] : vector<16x8xf32> to vector<16xf32>
    %10 = vector.shape_cast %9 : vector<16xf32> to vector<16x1xf32>
    %11 = arith.addf %8, %10 : vector<16x1xf32>
    %12 = arith.mulf %3, %3 : vector<16x8xf32>
    %cst_4 = arith.constant dense<0.000000e+00> : vector<16xf32>
    %13 = vector.multi_reduction <add>, %12, %cst_4 [1] : vector<16x8xf32> to vector<16xf32>
    %14 = vector.shape_cast %13 : vector<16xf32> to vector<16x1xf32>
    %15 = arith.mulf %6, %6 : vector<16x8xf32>
    %cst_5 = arith.constant dense<0.000000e+00> : vector<16xf32>
    %16 = vector.multi_reduction <add>, %15, %cst_5 [1] : vector<16x8xf32> to vector<16xf32>
    %17 = vector.shape_cast %16 : vector<16xf32> to vector<16x1xf32>
    %18 = arith.addf %14, %17 : vector<16x1xf32>
    %cst_6 = arith.constant 6.250000e-02 : f32
    %19 = vector.broadcast %cst_6 : f32 to vector<16x1xf32>
    %20 = arith.mulf %11, %19 : vector<16x1xf32>
    %cst_7 = arith.constant 6.250000e-02 : f32
    %21 = vector.broadcast %cst_7 : f32 to vector<16x1xf32>
    %22 = arith.mulf %18, %21 : vector<16x1xf32>
    %23 = arith.mulf %20, %20 : vector<16x1xf32>
    %24 = arith.subf %22, %23 : vector<16x1xf32>
    %cst_8 = arith.constant 0.000000e+00 : f32
    %25 = vector.broadcast %cst_8 : f32 to vector<16x1xf32>
    %26 = arith.maximumf %24, %25 : vector<16x1xf32>
    %cst_9 = arith.constant 9.99999974E-6 : f32
    %27 = vector.broadcast %cst_9 : f32 to vector<16x1xf32>
    %28 = arith.addf %26, %27 : vector<16x1xf32>
    %29 = math.rsqrt %28 : vector<16x1xf32>
    %cst_10 = arith.constant 0.000000e+00 : f32
    %30 = vector.broadcast %cst_10 : f32 to vector<16x1xf32>
    %31 = arith.subf %30, %20 : vector<16x1xf32>
    %32 = arith.mulf %31, %29 : vector<16x1xf32>
    %33 = vector.broadcast %29 : vector<16x1xf32> to vector<16x8xf32>
    %34 = arith.mulf %3, %33 : vector<16x8xf32>
    %35 = vector.broadcast %32 : vector<16x1xf32> to vector<16x8xf32>
    %36 = arith.addf %34, %35 : vector<16x8xf32>
    %37 = vector.broadcast %29 : vector<16x1xf32> to vector<16x8xf32>
    %38 = arith.mulf %6, %37 : vector<16x8xf32>
    %39 = vector.broadcast %32 : vector<16x1xf32> to vector<16x8xf32>
    %40 = arith.addf %38, %39 : vector<16x8xf32>
    %41 = tpu.concatenate %36, %40 in 1 : vector<16x8xf32>, vector<16x8xf32> -> vector<16x16xf32>
    %c0_11 = arith.constant 0 : index
    %c0_12 = arith.constant 0 : index
    %42 = vector.load %arg3[%c0_11, %c0_12] : memref<16x8xf32, #tpu.memory_space<vmem>>, vector<16x8xf32>
    %cst_13 = arith.constant dense<0.000000e+00> : vector<16x8xf32>
    %43 = tpu.matmul %41, %42, %cst_13 {dimension_numbers = #tpu.dot_dimension_numbers<[1], [0], [0], [1], [0, 0, 1, 1], [], []>} : vector<16x16xf32>, vector<16x8xf32>, vector<16x8xf32> -> vector<16x8xf32>
    %c0_14 = arith.constant 0 : index
    %c0_15 = arith.constant 0 : index
    %44 = vector.load %arg2[%c0_14, %c0_15] : memref<1x8xf32, #tpu.memory_space<vmem>>, vector<1x8xf32>
    %45 = vector.broadcast %44 : vector<1x8xf32> to vector<16x8xf32>
    %46 = arith.addf %43, %45 : vector<16x8xf32>
    %c0_16 = arith.constant 0 : index
    %c0_17 = arith.constant 0 : index
    %47 = vector.load %arg4[%c0_16, %c0_17] : memref<16x8xf32, #tpu.memory_space<vmem>>, vector<16x8xf32>
    tpu.vector_store %arg4[%c0_16, %c0_17], %46 {strides = array<i32>} : memref<16x8xf32, #tpu.memory_space<vmem>>, vector<16x8xf32>,
    return
  }
  func.func @transform_0(%arg0: i32) -> (i32, i32, i32, i32) {
    %c0_i32 = arith.constant 0 : i32
    %c0_i32_0 = arith.constant 0 : i32
    %c0_i32_1 = arith.constant 0 : i32
    %c0_i32_2 = arith.constant 0 : i32
    return %arg0, %c0_i32, %c0_i32_0, %c0_i32_1 : i32, i32, i32, i32
  }
  func.func @transform_1(%arg0: i32) -> (i32, i32) {
    %c0_i32 = arith.constant 0 : i32
    %c0_i32_0 = arith.constant 0 : i32
    %c0_i32_1 = arith.constant 0 : i32
    return %c0_i32, %c0_i32_0 : i32, i32
  }
  func.func @transform_2(%arg0: i32) -> (i32, i32) {
    %c0_i32 = arith.constant 0 : i32
    %c0_i32_0 = arith.constant 0 : i32
    %c0_i32_1 = arith.constant 0 : i32
    return %c0_i32, %c0_i32_0 : i32, i32
  }
  func.func @transform_3(%arg0: i32) -> (i32, i32) {
    %c0_i32 = arith.constant 0 : i32
    %c0_i32_0 = arith.constant 0 : i32
    return %arg0, %c0_i32 : i32, i32
  }
}

</mosaic_0001>

<bundles_post_ra>
// kernel: tpu_custom_call.1
= control target key start
LH: loop header
LB: loop body
LE: loop exit
PB: predicated region body
PF: predicated region fallthrough
CT: control target
= control target key end

     0   :  { %s422_s12 = smov 0   ;;  %s488_s0 = inlined_call_operand.vmem [shape: f32[16,2,8,8], index: 0, kind: input, shape index: {}]   ;;  %s489_s1 = inlined_call_operand.vmem [shape: f32[1,8], index: 1, kind: input, shape index: {}]   ;;  %s490_s2 = inlined_call_operand.vmem [shape: f32[16,8], index: 2, kind: input, shape index: {}]   ;;  %s491_s3 = inlined_call_operand.vmem [shape: f32[128,8], index: 3, kind: output, shape index: {}]  }
   0x1 LB: > { %s362_s13 = sadd.s32 4294967295, %s399_s12   ;;  %p366_p0 = scmp.ge.s32.totalorder %s399_s12, 1  ;;  %s399_s12 = sphi %s422_s12, %s13_s12  }
   0x2   : > { %p139_p1 = scmp.lt.s32.totalorder %s399_s12, 9 }
   0x4   : > { %p140_p2 = pnand %p366_p0, %p139_p1 }
   0x5   : > { %s367_s14 = sshll.u32 (!%p140_p2), %s362_s13, 1  ;;  %s401_s21 = smov (!%p140_p2), 8  }
   0x6   : > { %143 = sbr.rel (%p140_p2) target bundleno = 425 (0x1a9), region = 32  ;;  %p165_p3 = scmp.lt.s32.totalorder (!%p140_p2), %s367_s14, 15 }
   0xb   : > { %s493_s14 = smov (!%p165_p3, %s367_s14), 15  ;;  %vm181_vm0 = vcmask 64512   ;;  %v269_v30 = vld [vmem:[%s490_s2 + $0x8] sm:$0xff]  ;;  %vm274_vm7 = vcmask 130048  }
   0xc   : > { %s376_s15 = sshll.u32 %s493_s14, 4  ;;  %295 = vmatpush.msra.mxu0 %v269_v30  ;;  %377 = vmatpush.msra.mxu1 %v269_v30  ;;  %s371_s24 = sshll.u32 %s493_s14, 3 }
   0xd   : > { %s169_s18 = scalar_lea.vmem %s488_s0, %s376_s15  ;;  %s175_s29 = scalar_lea.vmem %s491_s3, %s371_s24 }
   0xe   : > { %v436_v0 = vld [vmem:[%s169_s18 + $0x8] sm:$0xff]  ;;  %v438_v1 = vld [vmem:[%s169_s18] sm:$0xff]  ;;  %v447_v6 = vld [vmem:[%s169_s18 + $0x18] sm:$0xff] }
   0xf   : > { %v188_v2 = vsel %vm181_vm0, %v436_v0, 0.0  ;;  %v182_v3 = vsel %vm181_vm0, %v438_v1, 0.0  ;;  %v196_v4 = vmul.f32 %v438_v1, %v438_v1  ;;  %v449_v7 = vld [vmem:[%s169_s18 + $0x10] sm:$0xff]  ;;  %v191_v9 = vsel %vm181_vm0, %v447_v6, 0.0 }
  0x10   : > { %189 = vadd.xlane.f32.xlu1 %v188_v2  ;;  %183 = vadd.xlane.f32.xlu0 %v182_v3  ;;  %v197_v8 = vmul.f32 %v449_v7, %v449_v7  ;;  %v185_v10 = vsel %vm181_vm0, %v449_v7, 0.0  ;;  %v205_v12 = vmul.f32 %v447_v6, %v447_v6  ;;  %v204_v13 = vmul.f32 %v436_v0, %v436_v0 }
  0x11   : > { %v198_v5 = vsel %vm181_vm0, %v196_v4, 0.0 }
  0x12   : > { %199 = vadd.xlane.f32.xlu2 %v198_v5  ;;  %v201_v11 = vsel %vm181_vm0, %v197_v8, 0.0  ;;  %v209_v14 = vsel %vm181_vm0, %v205_v12, 0.0  ;;  %v206_v15 = vsel %vm181_vm0, %v204_v13, 0.0  ;;  %v268_v5 = vld [vmem:[%s490_s2] sm:$0xff] }
  0x13   : > { %296 = vmatpush.msra.mxu0 %v268_v5  ;;  %378 = vmatpush.msra.mxu1 %v268_v5  ;;  %v388_v8 = vld [vmem:[%s489_s1] ss:$0 sm:$0xff] }
  0x18   : > { %192 = vadd.xlane.f32.xlu1 %v191_v9  ;;  %186 = vadd.xlane.f32.xlu0 %v185_v10 }
  0x1a   : > { %202 = vadd.xlane.f32.xlu2 %v201_v11 }
  0x20   : > { %210 = vadd.xlane.f32.xlu1 %v209_v14  ;;  %207 = vadd.xlane.f32.xlu0 %v206_v15 }
  0x83   : > { %v190_v16 = vpop.xlane.xlu1 %189  ;;  %v184_v17 = vpop.xlane.xlu0 %183 }
  0x84   : > { %v194_v21 = vadd.f32 %v190_v16, %v184_v17 }
  0x85   : > { %v200_v18 = vpop.xlane.xlu2 %199 }
  0x86   : > { %v214_v24 = vmul.f32 0.0625, %v194_v21 }
  0x88   : > { %v218_v31 = vmul.f32 %v214_v24, %v214_v24  ;;  %v246_v54 = vsub.f32 0.0, %v214_v24 }
  0x8b   : > { %v193_v19 = vpop.xlane.xlu1 %192  ;;  %v187_v20 = vpop.xlane.xlu0 %186 }
  0x8c   : > { %v195_v22 = vadd.f32 %v193_v19, %v187_v20 }
  0x8d   : > { %v203_v23 = vpop.xlane.xlu2 %202 }
  0x8e   : > { %v215_v25 = vmul.f32 0.0625, %v195_v22 }
  0x90   : > { %v219_v32 = vmul.f32 %v215_v25, %v215_v25  ;;  %v247_v52 = vsub.f32 0.0, %v215_v25 }
  0x93   : > { %v211_v26 = vpop.xlane.xlu1 %210  ;;  %v208_v27 = vpop.xlane.xlu0 %207 }
  0x94   : > { %v213_v28 = vadd.f32 %v211_v26, %v203_v23  ;;  %v212_v29 = vadd.f32 %v208_v27, %v200_v18 }
  0x96   : > { %v217_v33 = vmul.f32 0.0625, %v213_v28  ;;  %v216_v34 = vmul.f32 0.0625, %v212_v29 }
  0x98   : > { %v221_v35 = vsub.f32 %v217_v33, %v219_v32  ;;  %v220_v36 = vsub.f32 %v216_v34, %v218_v31 }
  0x9a   : > { %v223_v37 = vmax.f32 %v221_v35, 0.0  ;;  %v222_v38 = vmax.f32 %v220_v36, 0.0 }
  0x9c   : > { %v225_v39 = vadd.f32 1e-05, %v223_v37  ;;  %v224_v40 = vadd.f32 1e-05, %v222_v38 }
  0x9e   : > { %389 = vrsqrt.f32 %v225_v39  ;;  %vm242_vm3 = vweird.f32 %v225_v39  ;;  %vm232_vm5 = vweird.f32 %v224_v40 }
  0x9f   : > { %391 = vrsqrt.f32 %v224_v40 }
  0xa4   : > { %v390_v41 = vpop.eup %389 }
  0xa5   : > { %v392_v42 = vpop.eup %391  ;;  %v237_v43 = vmul.f32 %v390_v41, %v225_v39  ;;  %vm243_vm1 = vweird.f32 %v390_v41 }
  0xa6   : > { %v227_v44 = vmul.f32 %v392_v42, %v224_v40  ;;  %vm233_vm2 = vweird.f32 %v392_v42  ;;  %vm244_vm4 = vmor %vm242_vm3, %vm243_vm1 }
  0xa7   : > { %v238_v45 = vmul.f32 %v390_v41, %v237_v43  ;;  %vm234_vm6 = vmor %vm232_vm5, %vm233_vm2 }
  0xa8   : > { %v228_v46 = vmul.f32 %v392_v42, %v227_v44 }
  0xa9   : > { %v239_v47 = vmul.f32 0.5, %v238_v45 }
  0xaa   : > { %v229_v48 = vmul.f32 0.5, %v228_v46 }
  0xab   : > { %v240_v49 = vsub.f32 1.5, %v239_v47 }
  0xac   : > { %v230_v50 = vsub.f32 1.5, %v229_v48 }
  0xad   : > { %v241_v51 = vmul.f32 %v390_v41, %v240_v49 }
  0xae   : > { %v231_v53 = vmul.f32 %v392_v42, %v230_v50 }
  0xaf   : > { %v245_v55 = vsel %vm244_vm4, %v390_v41, %v241_v51 }
  0xb0   : > { %v249_v56 = vmul.f32 %v247_v52, %v245_v55  ;;  %v255_v57 = vmul.f32 %v245_v55, %v447_v6  ;;  %v235_v58 = vsel %vm234_vm6, %v392_v42, %v231_v53  ;;  %v251_v59 = vmul.f32 %v245_v55, %v449_v7 }
  0xb1   : > { %v248_v60 = vmul.f32 %v246_v54, %v235_v58  ;;  %v254_v61 = vmul.f32 %v235_v58, %v436_v0  ;;  %v250_v62 = vmul.f32 %v235_v58, %v438_v1 }
  0xb2   : > { %v257_v63 = vadd.f32 %v255_v57, %v249_v56  ;;  %v253_v2 = vadd.f32 %v251_v59, %v249_v56 }
  0xb3   : > { %v256_v3 = vadd.f32 %v254_v61, %v248_v60  ;;  %v252_v4 = vadd.f32 %v250_v62, %v248_v60 }
  0xb4   : > { %262 = vrot.lane.b32.xlu0 %v257_v63, %s401_s21 }
  0xb5   : > { %260 = vrot.lane.b32.xlu2 %v256_v3, %s401_s21 }
 0x10f   : > { %v261_v6 = vpop.permute.xlu2 %260 }
 0x110   : > { %v266_v0 = vsel %vm181_vm0, %v252_v4, %v261_v6 }
 0x111   : > { %372 = vmatmul.msk.f32.vlgmr.msra.gmra.mxu0 %vm274_vm7, %v266_v0 }
 0x126   : > { %v263_v1 = vpop.permute.xlu0 %262 }
 0x127   : > { %v267_v7 = vsel %vm181_vm0, %v253_v2, %v263_v1 }
 0x128   : > { %373 = vmatmul.msk.f32.vlgmr.msra.gmra.mxu1 %vm274_vm7, %v267_v7 }
 0x18e   : > { %v298_v9 = vpop.f32.mrf.mxu0 }
 0x18f   : > { %v299_v10 = vadd.f32 %v388_v8, %v298_v9 }
 0x191   : > { %304 = vst.msk [vmem:[%s175_s29] sm:$0xff] %vm181_vm0, %v299_v10 }
 0x1a5   : > { %v301_v11 = vpop.f32.mrf.mxu1 }
 0x1a6   : > { %v302_v12 = vadd.f32 %v388_v8, %v301_v11 }
 0x1a8   : > { %305 = vst.msk [vmem:[%s175_s29 + $0x8] sm:$0xff] %vm181_vm0, %v302_v12 }
 0x1a9 PF: > { %s13_s12 = sadd.s32 1, %s399_s12  }
 0x1aa   : > { %p10_p4 = scmp.ge.s32.totalorder %s13_s12, 10  }
 0x1ac   :  { %12 = sbr.rel (!%p10_p4) target bundleno = 1 (0x1), region = 62 }

</bundles_post_ra>
